<compile_context>
chip_gen: v7x
topology: tpu7x:2x2x1
jax: 0.10.0
libtpu: 0.0.40
codegen_flags: <defaults>
</compile_context>

<pallas_src>
import functools

import jax
import jax.numpy as jnp
from jax import lax
from jax.experimental import pallas as pl
from jax.experimental.pallas import tpu as pltpu


_EPS_BN = 1e-5
# x / clamp(sqrt(s), 1e-8)  ==  x * rsqrt(max(s, 1e-16))   (sqrt is monotonic)
_NORM_CLAMP_SQ = 1e-16

# Single-block regime: x block + out block (+ head operands) must fit in VMEM
# with double-buffering headroom under the explicit limit below.
_SINGLE_BLOCK_BYTES = 16 << 20
# Pipeline-buffer budget for the tiled paths (double-buffered in+out tiles plus
# small resident operands).  Conservative for v7x's 64 MiB physical VMEM.
_PIPELINE_VMEM_BUDGET = 24 << 20
# Explicit scoped-VMEM limit: > v5e's 16 MiB default, < v7x's 64 MiB physical.
_VMEM_LIMIT_BYTES = 40 << 20


# --------------------------------------------------------------------------
# Kernels
# --------------------------------------------------------------------------
def _etf_single_block_kernel(x_ref, gamma_ref, beta_ref, *rest,
                             apply_bn, with_logits, bf16_matmul, eps):
    """Whole (B, D) array resident in one VMEM block."""
    if with_logits:
        m_ref, o_ref, logits_ref = rest
    else:
        (o_ref,) = rest

    x = x_ref[...].astype(jnp.float32)                        # (B, D)

    if apply_bn:
        # Centered (PyTorch-faithful) biased batch statistics; everything is
        # already VMEM-resident so the extra reduction is cheap XLU work.
        mean = jnp.mean(x, axis=0, keepdims=True)             # (1, D)
        xc = x - mean
        var = jnp.mean(xc * xc, axis=0, keepdims=True)        # (1, D)
        # Fold gamma into the (1, D) rsqrt before broadcasting (saves a
        # full-size VPU multiply).
        x = xc * (lax.rsqrt(var + eps) * gamma_ref[...]) + beta_ref[...]

    # Row-wise L2 normalization: one EUP rsqrt + VPU mul (no sqrt + divide).
    sq = jnp.sum(x * x, axis=1, keepdims=True)                # (B, 1)
    xn = x * lax.rsqrt(jnp.maximum(sq, _NORM_CLAMP_SQ))
    o_ref[...] = xn.astype(o_ref.dtype)

    if with_logits:
        lhs = xn.astype(jnp.bfloat16) if bf16_matmul else xn
        logits_ref[...] = jnp.dot(
            lhs, m_ref[...], preferred_element_type=jnp.float32
        ).astype(logits_ref.dtype)


def _bn_stats_kernel(x_ref, pivot_ref, sum_ref, ssq_ref, *,
                     tb, total_b, nb, nbh, may_mask):
    """Pass 1 (tiled path): per-core shifted sum / sumsq accumulation over B.

    Grid is (ncores, nbh): the leading "parallel" axis splits the row tiles
    across both TensorCores on v7x; each core owns one (1, 1, D) accumulator
    row.  Sums are computed on (x - pivot) with pivot = x[0] to avoid the
    E[x^2] - E[x]^2 cancellation problem.
    """
    del nb
    c = pl.program_id(0)
    i = pl.program_id(1)
    g = c * nbh + i                      # global (unclamped) row-tile index

    @pl.when(i == 0)
    def _():
        sum_ref[...] = jnp.zeros_like(sum_ref)
        ssq_ref[...] = jnp.zeros_like(ssq_ref)

    def accumulate(mask_rows):
        xs = x_ref[...].astype(jnp.float32) - pivot_ref[...]  # (tb, D)
        if mask_rows:
            # Partial last tile and/or clamped phantom tile: zero out rows
            # past the true batch (garbage / re-read data contributes 0).
            row = lax.broadcasted_iota(jnp.int32, xs.shape, 0) + g * tb
            xs = jnp.where(row < total_b, xs, 0.0)
        sum_ref[...] += jnp.sum(xs, axis=0, keepdims=True)[None]
        ssq_ref[...] += jnp.sum(xs * xs, axis=0, keepdims=True)[None]

    if may_mask:
        # Only the last (partial) / phantom tiles pay the iota+select cost.
        @pl.when(g * tb + tb <= total_b)
        def _():
            accumulate(False)

        @pl.when(g * tb + tb > total_b)
        def _():
            accumulate(True)
    else:
        accumulate(False)


def _affine_l2_norm_kernel(x_ref, scale_ref, shift_ref, o_ref):
    """Pass 2 (tiled path): folded BN affine + L2 normalize on a row tile.

    NOTE: the last row tile may contain padding rows; they are computed on
    whatever data Pallas fetched past the boundary, but every reduction here
    is per-row (axis=1) so valid rows never depend on them and Pallas clips
    the writeback to the array bounds.
    """
    xh = x_ref[...].astype(jnp.float32) * scale_ref[...] + shift_ref[...]
    sq = jnp.sum(xh * xh, axis=1, keepdims=True)              # (tb, 1)
    o_ref[...] = (xh * lax.rsqrt(jnp.maximum(sq, _NORM_CLAMP_SQ))
                  ).astype(o_ref.dtype)


def _affine_l2_norm_logits_kernel(x_ref, scale_ref, shift_ref, m_ref,
                                  o_ref, logits_ref, *, bf16_matmul):
    """Tiled fused head: folded BN + L2 normalize + (normalized_x @ ori_M)."""
    xh = x_ref[...].astype(jnp.float32) * scale_ref[...] + shift_ref[...]
    sq = jnp.sum(xh * xh, axis=1, keepdims=True)
    xn = xh * lax.rsqrt(jnp.maximum(sq, _NORM_CLAMP_SQ))
    o_ref[...] = xn.astype(o_ref.dtype)
    lhs = xn.astype(jnp.bfloat16) if bf16_matmul else xn
    logits_ref[...] = jnp.dot(
        lhs, m_ref[...], preferred_element_type=jnp.float32
    ).astype(logits_ref.dtype)


# --------------------------------------------------------------------------
# Wrapper helpers
# --------------------------------------------------------------------------
def _as_row(p, d):
    """Return param as (1, d) float32; no-op (no emitted ops) if already so."""
    p = jnp.asarray(p)
    if p.shape != (1, d) or p.dtype != jnp.float32:
        p = p.reshape(1, d).astype(jnp.float32)
    return p


def _sublane_pack(dtype):
    """Row-tile alignment matching the dtype's sublane packing."""
    return max(8, 32 // jnp.dtype(dtype).itemsize)


def _pick_row_tile(B, D, row_tile, in_itemsize, out_itemsize,
                   extra_per_row, resident_bytes, pack):
    """Size the row tile so double-buffered in/out tiles fit the VMEM budget."""
    budget = max(_PIPELINE_VMEM_BUDGET - resident_bytes, 4 << 20)
    per_row = 2 * D * (in_itemsize + out_itemsize) + extra_per_row
    tb = min(int(row_tile), max(budget // per_row, pack), B)
    tb = max(pack, (tb // pack) * pack)
    return int(tb)


def _bn_scale_shift(x, gamma2, beta2, eps, tb):
    """Tiled BN stats pass (both TensorCores) -> folded (scale, shift), (1, D)."""
    B, D = x.shape
    nb = pl.cdiv(B, tb)
    ncores = 2 if nb >= 2 else 1          # megacore split on v7x; cheap elsewhere
    nbh = pl.cdiv(nb, ncores)
    may_mask = (B % tb != 0) or (ncores * nbh != nb)
    pivot = x[0:1].astype(jnp.float32)    # shifted-variance pivot (tiny slice)

    if ncores * nbh == nb:
        x_map = lambda c, i: (c * nbh + i, 0)
    else:
        # Phantom tile of the odd split: clamp to the last real tile (its rows
        # are fully masked inside the kernel, so it contributes zero).
        x_map = lambda c, i: (jnp.minimum(c * nbh + i, nb - 1), 0)

    psum, pssq = pl.pallas_call(
        functools.partial(_bn_stats_kernel, tb=tb, total_b=B, nb=nb, nbh=nbh,
                          may_mask=may_mask),
        out_shape=(jax.ShapeDtypeStruct((ncores, 1, D), jnp.float32),
                   jax.ShapeDtypeStruct((ncores, 1, D), jnp.float32)),
        grid=(ncores, nbh),
        in_specs=[
            pl.BlockSpec((tb, D), x_map),
            pl.BlockSpec((1, D), lambda c, i: (0, 0)),
        ],
        out_specs=(pl.BlockSpec((1, 1, D), lambda c, i: (c, 0, 0)),
                   pl.BlockSpec((1, 1, D), lambda c, i: (c, 0, 0))),
        compiler_params=pltpu.CompilerParams(
            dimension_semantics=("parallel", "arbitrary"),
            vmem_limit_bytes=_VMEM_LIMIT_BYTES),
    )(x, pivot)

    # Tiny (ncores,1,D) -> (1,D) combine + affine fold: plain XLA is fine here.
    inv_b = 1.0 / B
    ds = jnp.sum(psum, axis=0) * inv_b                       # mean of (x - pivot)
    var = jnp.maximum(jnp.sum(pssq, axis=0) * inv_b - ds * ds, 0.0)
    mean = pivot + ds
    scale = gamma2 * lax.rsqrt(var + eps)                    # (1, D)
    shift = beta2 - mean * scale                             # (1, D)
    return scale, shift


# --------------------------------------------------------------------------
# Public wrappers
# --------------------------------------------------------------------------
def etf_classifier_forward(x, gamma, beta, *, eps=_EPS_BN, row_tile=1024,
                           force_tiled=False):
    """ETF_Classifier.forward.  x: (B, D).  gamma/beta: (1, D) or (D,)."""
    B, D = x.shape
    apply_bn = B > 1                       # static shape -> static branch
    gamma2 = _as_row(gamma, D)
    beta2 = _as_row(beta, D)
    itemsize = jnp.dtype(x.dtype).itemsize

    small = B * D * 2 * itemsize <= _SINGLE_BLOCK_BYTES      # x-block + out-block
    if small and not force_tiled:
        kernel = functools.partial(_etf_single_block_kernel, apply_bn=apply_bn,
                                   with_logits=False, bf16_matmul=False, eps=eps)
        return pl.pallas_call(
            kernel,
            out_shape=jax.ShapeDtypeStruct((B, D), x.dtype),
            grid=(1,),
            in_specs=[pl.BlockSpec((B, D), lambda i: (0, 0)),
                      pl.BlockSpec((1, D), lambda i: (0, 0)),
                      pl.BlockSpec((1, D), lambda i: (0, 0))],
            out_specs=pl.BlockSpec((B, D), lambda i: (0, 0)),
            compiler_params=pltpu.CompilerParams(
                dimension_semantics=("arbitrary",),
                vmem_limit_bytes=_VMEM_LIMIT_BYTES),
        )(x, gamma2, beta2)

    # ---- Large-batch two-pass tiled path --------------------------------
    pack = _sublane_pack(x.dtype)
    tb = _pick_row_tile(B, D, row_tile, itemsize, itemsize,
                        extra_per_row=0, resident_bytes=2 * D * 4, pack=pack)
    nb = pl.cdiv(B, tb)

    if apply_bn:
        scale, shift = _bn_scale_shift(x, gamma2, beta2, eps, tb)
    else:
        scale = jnp.ones((1, D), jnp.float32)
        shift = jnp.zeros((1, D), jnp.float32)

    return pl.pallas_call(
        _affine_l2_norm_kernel,
        out_shape=jax.ShapeDtypeStruct((B, D), x.dtype),
        grid=(nb,),
        in_specs=[pl.BlockSpec((tb, D), lambda i: (i, 0)),
                  pl.BlockSpec((1, D), lambda i: (0, 0)),
                  pl.BlockSpec((1, D), lambda i: (0, 0))],
        out_specs=pl.BlockSpec((tb, D), lambda i: (i, 0)),
        compiler_params=pltpu.CompilerParams(
            dimension_semantics=("parallel",),        # megacore sharding on v7x
            vmem_limit_bytes=_VMEM_LIMIT_BYTES),
    )(x, scale, shift)


def etf_classifier_forward_with_logits(x, gamma, beta, ori_M, *, eps=_EPS_BN,
                                        row_tile=1024, bf16_matmul=False,
                                        force_tiled=False):
    """Optional fused head: returns (normalized_x, normalized_x @ ori_M).

    forward() itself only returns normalized_x; this variant fuses the
    downstream ETF matmul so the normalized block never round-trips HBM.
    ori_M is padded to a lane-dense multiple of 128 columns inside the wrapper
    and the padded logits are sliced back to C afterwards.
    """
    B, D = x.shape
    C = ori_M.shape[1]
    C_pad = ((C + 127) // 128) * 128
    apply_bn = B > 1
    gamma2 = _as_row(gamma, D)
    beta2 = _as_row(beta, D)

    m = jnp.asarray(ori_M, jnp.float32)
    if C_pad != C:
        m = jnp.pad(m, ((0, 0), (0, C_pad - C)))
    if bf16_matmul:
        m = m.astype(jnp.bfloat16)
    m_itemsize = jnp.dtype(m.dtype).itemsize
    itemsize = jnp.dtype(x.dtype).itemsize

    footprint = (B * D * 2 * itemsize          # x block + normalized-x block
                 + B * C_pad * 4               # logits block
                 + D * C_pad * m_itemsize)     # resident ori_M
    small = footprint <= _SINGLE_BLOCK_BYTES

    if small and not force_tiled:
        kernel = functools.partial(_etf_single_block_kernel, apply_bn=apply_bn,
                                   with_logits=True, bf16_matmul=bf16_matmul,
                                   eps=eps)
        out, logits = pl.pallas_call(
            kernel,
            out_shape=(jax.ShapeDtypeStruct((B, D), x.dtype),
                       jax.ShapeDtypeStruct((B, C_pad), jnp.float32)),
            grid=(1,),
            in_specs=[pl.BlockSpec((B, D), lambda i: (0, 0)),
                      pl.BlockSpec((1, D), lambda i: (0, 0)),
                      pl.BlockSpec((1, D), lambda i: (0, 0)),
                      pl.BlockSpec((D, C_pad), lambda i: (0, 0))],
            out_specs=(pl.BlockSpec((B, D), lambda i: (0, 0)),
                       pl.BlockSpec((B, C_pad), lambda i: (0, 0))),
            compiler_params=pltpu.CompilerParams(
                dimension_semantics=("arbitrary",),
                vmem_limit_bytes=_VMEM_LIMIT_BYTES),
        )(x, gamma2, beta2, m)
        return out, logits[:, :C]

    # ---- Large-batch: folded-BN stats pass + row-tiled fused head --------
    pack = _sublane_pack(x.dtype)
    resident = D * C_pad * m_itemsize + 2 * D * 4
    tb = _pick_row_tile(B, D, row_tile, itemsize, itemsize,
                        extra_per_row=2 * C_pad * 4,
                        resident_bytes=resident, pack=pack)
    nb = pl.cdiv(B, tb)

    if apply_bn:
        scale, shift = _bn_scale_shift(x, gamma2, beta2, eps, tb)
    else:
        scale = jnp.ones((1, D), jnp.float32)
        shift = jnp.zeros((1, D), jnp.float32)

    out, logits = pl.pallas_call(
        functools.partial(_affine_l2_norm_logits_kernel,
                          bf16_matmul=bf16_matmul),
        out_shape=(jax.ShapeDtypeStruct((B, D), x.dtype),
                   jax.ShapeDtypeStruct((B, C_pad), jnp.float32)),
        grid=(nb,),
        in_specs=[pl.BlockSpec((tb, D), lambda i: (i, 0)),
                  pl.BlockSpec((1, D), lambda i: (0, 0)),
                  pl.BlockSpec((1, D), lambda i: (0, 0)),
                  pl.BlockSpec((D, C_pad), lambda i: (0, 0))],
        out_specs=(pl.BlockSpec((tb, D), lambda i: (i, 0)),
                   pl.BlockSpec((tb, C_pad), lambda i: (i, 0))),
        compiler_params=pltpu.CompilerParams(
            dimension_semantics=("parallel",),
            vmem_limit_bytes=_VMEM_LIMIT_BYTES),
    )(x, scale, shift, m)
    return out, logits[:, :C]


# --------------------------------------------------------------------------
# Parameter construction (plain-JAX glue, mirrors ETF_Classifier.__init__)
# --------------------------------------------------------------------------
def make_etf_params(feat_in, num_classes, key):
    a = jax.random.uniform(key, (feat_in, num_classes), dtype=jnp.float32)
    P, _ = jnp.linalg.qr(a)                                   # (feat_in, C)
    I = jnp.eye(num_classes, dtype=jnp.float32)
    one = jnp.ones((num_classes, num_classes), dtype=jnp.float32)
    M = jnp.sqrt(num_classes / (num_classes - 1.0)) * (P @ (I - one / num_classes))
    # BN affine init: weight=1, bias=0; stored hoisted as (1, D) float32.
    gamma = jnp.ones((1, feat_in), dtype=jnp.float32)
    beta = jnp.zeros((1, feat_in), dtype=jnp.float32)
    return M, gamma, beta


def _reference(x, gamma, beta, eps=_EPS_BN):
    x = x.astype(jnp.float32)
    if x.shape[0] > 1:
        mean = jnp.mean(x, axis=0, keepdims=True)
        var = jnp.mean((x - mean) ** 2, axis=0, keepdims=True)
        x = (x - mean) / jnp.sqrt(var + eps) * gamma.reshape(1, -1) + beta.reshape(1, -1)
    n = jnp.maximum(jnp.sqrt(jnp.sum(x * x, axis=1, keepdims=True)), 1e-8)
    return x / n


# TODO(synk): gen_sparse_ETF / test_etf / reg_ETF are host-side training-loop
# utilities (Adam optimization, acos statistics, MSE loss), not part of
# forward(); they are intentionally not implemented as Pallas kernels.

if __name__ == "__main__":
    key = jax.random.PRNGKey(0)
    k1, k2, k3, k4, k5 = jax.random.split(key, 5)

    # Small shapes consistent with the module head.
    B, feat_in, num_classes = 8, 32, 10
    ori_M, gamma, beta = make_etf_params(feat_in, num_classes, k1)
    x = jax.random.normal(k2, (B, feat_in), dtype=jnp.float32)
    ref = _reference(x, gamma, beta)

    # 1) Plain forward (single-block kernel).
    out = jax.block_until_ready(etf_classifier_forward(x, gamma, beta))
    assert out.shape == (B, feat_in)
    assert jnp.allclose(out, ref, atol=1e-5, rtol=1e-5)

    # 2) batch == 1 path (BN skipped).
    out1 = jax.block_until_ready(etf_classifier_forward(x[:1], gamma, beta))
    ref1 = _reference(x[:1], gamma, beta)
    assert jnp.allclose(out1, ref1, atol=1e-5, rtol=1e-5)

    # 3) Fused ETF head (single-block, lane-padded logits).
    outn, logits = etf_classifier_forward_with_logits(x, gamma, beta, ori_M)
    outn = jax.block_until_ready(outn)
    logits = jax.block_until_ready(logits)
    assert logits.shape == (B, num_classes)
    assert jnp.allclose(outn, ref, atol=1e-5, rtol=1e-5)
    assert jnp.allclose(logits, ref @ ori_M, atol=1e-4, rtol=1e-4)

    # 4) Tiled two-pass path: odd tile count (exercises the 2-core split with
    #    a clamped phantom tile) plus a partial last tile.
    Bl, Dl = 1000, 256
    xl = jax.random.normal(k3, (Bl, Dl), dtype=jnp.float32)
    gl = jax.random.normal(k4, (1, Dl), dtype=jnp.float32) * 0.1 + 1.0
    bl = jax.random.normal(k5, (1, Dl), dtype=jnp.float32) * 0.1
    outl = jax.block_until_ready(
        etf_classifier_forward(xl, gl, bl, row_tile=224, force_tiled=True))
    refl = _reference(xl, gl, bl)
    assert outl.shape == (Bl, Dl)
    assert jnp.allclose(outl, refl, atol=1e-4, rtol=1e-4)

    # 5) Tiled fused head (stats pass + row-tiled matmul, padded logits).
    Bh, Dh = 512, 128
    xh = jax.random.normal(k3, (Bh, Dh), dtype=jnp.float32)
    Mh, gh, bh = make_etf_params(Dh, num_classes, k4)
    outh, logith = etf_classifier_forward_with_logits(
        xh, gh, bh, Mh, row_tile=128, force_tiled=True)
    outh = jax.block_until_ready(outh)
    logith = jax.block_until_ready(logith)
    refh = _reference(xh, gh, bh)
    assert jnp.allclose(outh, refh, atol=1e-4, rtol=1e-4)
    assert jnp.allclose(logith, refh @ Mh, atol=1e-4, rtol=1e-4)

    print("KERNEL_OK")
</pallas_src>

<mosaic_0001>
module attributes {stable_mosaic.version = 11 : i64} {
  func.func @_etf_single_block_kernel(%arg0: i32, %arg1: memref<8x32xf32, #tpu.memory_space<vmem>>, %arg2: memref<1x32xf32, #tpu.memory_space<vmem>>, %arg3: memref<1x32xf32, #tpu.memory_space<vmem>>, %arg4: memref<8x32xf32, #tpu.memory_space<vmem>>) attributes {dimension_semantics = [#tpu.dimension_semantics<arbitrary>], iteration_bounds = array<i64: 1>, scalar_prefetch = 0 : i64, scratch_operands = 0 : i64, tpu.core_type = #tpu.core_type<tc>, window_params = [{pipeline_mode = #tpu.pipeline_mode<synchronous>, transform_indices = @transform_0, window_bounds = array<i64: 8, 32>}, {pipeline_mode = #tpu.pipeline_mode<synchronous>, transform_indices = @transform_1, window_bounds = array<i64: 1, 32>}, {pipeline_mode = #tpu.pipeline_mode<synchronous>, transform_indices = @transform_2, window_bounds = array<i64: 1, 32>}, {pipeline_mode = #tpu.pipeline_mode<synchronous>, transform_indices = @transform_3, window_bounds = array<i64: 8, 32>}]} {
    %c0 = arith.constant 0 : index
    %c0_0 = arith.constant 0 : index
    %0 = vector.load %arg1[%c0, %c0_0] : memref<8x32xf32, #tpu.memory_space<vmem>>, vector<8x32xf32>
    %cst = arith.constant dense<0.000000e+00> : vector<32xf32>
    %1 = vector.multi_reduction <add>, %0, %cst [0] : vector<8x32xf32> to vector<32xf32>
    %2 = vector.shape_cast %1 : vector<32xf32> to vector<1x32xf32>
    %cst_1 = arith.constant 8.000000e+00 : f32
    %3 = vector.broadcast %cst_1 : f32 to vector<1x32xf32>
    %4 = arith.divf %2, %3 : vector<1x32xf32>
    %5 = vector.broadcast %4 : vector<1x32xf32> to vector<8x32xf32>
    %6 = arith.subf %0, %5 : vector<8x32xf32>
    %7 = arith.mulf %6, %6 : vector<8x32xf32>
    %cst_2 = arith.constant dense<0.000000e+00> : vector<32xf32>
    %8 = vector.multi_reduction <add>, %7, %cst_2 [0] : vector<8x32xf32> to vector<32xf32>
    %9 = vector.shape_cast %8 : vector<32xf32> to vector<1x32xf32>
    %cst_3 = arith.constant 8.000000e+00 : f32
    %10 = vector.broadcast %cst_3 : f32 to vector<1x32xf32>
    %11 = arith.divf %9, %10 : vector<1x32xf32>
    %cst_4 = arith.constant 9.99999974E-6 : f32
    %12 = vector.broadcast %cst_4 : f32 to vector<1x32xf32>
    %13 = arith.addf %11, %12 : vector<1x32xf32>
    %14 = math.rsqrt %13 : vector<1x32xf32>
    %c0_5 = arith.constant 0 : index
    %c0_6 = arith.constant 0 : index
    %15 = vector.load %arg2[%c0_5, %c0_6] : memref<1x32xf32, #tpu.memory_space<vmem>>, vector<1x32xf32>
    %16 = arith.mulf %14, %15 : vector<1x32xf32>
    %17 = vector.broadcast %16 : vector<1x32xf32> to vector<8x32xf32>
    %18 = arith.mulf %6, %17 : vector<8x32xf32>
    %c0_7 = arith.constant 0 : index
    %c0_8 = arith.constant 0 : index
    %19 = vector.load %arg3[%c0_7, %c0_8] : memref<1x32xf32, #tpu.memory_space<vmem>>, vector<1x32xf32>
    %20 = vector.broadcast %19 : vector<1x32xf32> to vector<8x32xf32>
    %21 = arith.addf %18, %20 : vector<8x32xf32>
    %22 = arith.mulf %21, %21 : vector<8x32xf32>
    %cst_9 = arith.constant dense<0.000000e+00> : vector<8xf32>
    %23 = vector.multi_reduction <add>, %22, %cst_9 [1] : vector<8x32xf32> to vector<8xf32>
    %24 = vector.shape_cast %23 : vector<8xf32> to vector<8x1xf32>
    %cst_10 = arith.constant 1.000000e-16 : f32
    %25 = vector.broadcast %cst_10 : f32 to vector<8x1xf32>
    %26 = arith.maximumf %24, %25 : vector<8x1xf32>
    %27 = math.rsqrt %26 : vector<8x1xf32>
    %28 = vector.broadcast %27 : vector<8x1xf32> to vector<8x32xf32>
    %29 = arith.mulf %21, %28 : vector<8x32xf32>
    %c0_11 = arith.constant 0 : index
    %c0_12 = arith.constant 0 : index
    %30 = vector.load %arg4[%c0_11, %c0_12] : memref<8x32xf32, #tpu.memory_space<vmem>>, vector<8x32xf32>
    tpu.vector_store %arg4[%c0_11, %c0_12], %29 {strides = array<i32>} : memref<8x32xf32, #tpu.memory_space<vmem>>, vector<8x32xf32>,
    return
  }
  func.func @transform_0(%arg0: i32) -> (i32, i32) {
    %c0_i32 = arith.constant 0 : i32
    %c0_i32_0 = arith.constant 0 : i32
    %c0_i32_1 = arith.constant 0 : i32
    return %c0_i32, %c0_i32_0 : i32, i32
  }
  func.func @transform_1(%arg0: i32) -> (i32, i32) {
    %c0_i32 = arith.constant 0 : i32
    %c0_i32_0 = arith.constant 0 : i32
    %c0_i32_1 = arith.constant 0 : i32
    return %c0_i32, %c0_i32_0 : i32, i32
  }
  func.func @transform_2(%arg0: i32) -> (i32, i32) {
    %c0_i32 = arith.constant 0 : i32
    %c0_i32_0 = arith.constant 0 : i32
    %c0_i32_1 = arith.constant 0 : i32
    return %c0_i32, %c0_i32_0 : i32, i32
  }
  func.func @transform_3(%arg0: i32) -> (i32, i32) {
    %c0_i32 = arith.constant 0 : i32
    %c0_i32_0 = arith.constant 0 : i32
    %c0_i32_1 = arith.constant 0 : i32
    return %c0_i32, %c0_i32_0 : i32, i32
  }
}

</mosaic_0001>

<bundles_post_ra>
// kernel: tpu_custom_call.1
= control target key start
LH: loop header
LB: loop body
LE: loop exit
PB: predicated region body
PF: predicated region fallthrough
CT: control target
= control target key end

     0   :  { %8 = vsyncpa [#allocation3], 0  ;;  %s199_s0 = inlined_call_operand.hbm [shape: f32[8,32], index: 0, kind: input, shape index: {}]   ;;  %s200_s1 = inlined_call_operand.vmem [shape: f32[1,32], index: 1, kind: input, shape index: {}]   ;;  %s201_s2 = inlined_call_operand.vmem [shape: f32[1,32], index: 2, kind: input, shape index: {}]   ;;  %s202_s3 = inlined_call_operand.hbm [shape: f32[8,32], index: 3, kind: output, shape index: {}]  }
   0x1   :  { %9 = vsyncpa [#allocation4], 0  ;;  %s143_s12 = smov [#allocation2]   ;;  %s95_s16 = scalar_lea.hbm %s199_s0, 128 }
   0x2   :  { %s16_s13 = sshll.u32 %s143_s12, 4  ;;  %p96_p0 = scmp.ne.s32.totalorder %s199_s0, %s95_s16  ;;  %s17_s13 = int_to_ptr.vmem [resolvable:$true] %s16_s13 }
   0x3   :  { %p99_p1 = scmp.lt.u32.totalorder %s95_s16, %s199_s0 }
   0x5   :  { %p101_p2 = pnand %p99_p1, %p96_p0 }
   0x7   :  { %104 = shalt.err (!%p101_p2)
}
   0x8   :  { %s105_s21 = scalar_lea.vmem %s17_s13, 128  ;;  %p110_p4 = scmp.lt.s32.totalorder %s17_s13, %s17_s13 }
   0x9   :  { %p106_p3 = scmp.ne.s32.totalorder %s17_s13, %s105_s21  ;;  %p111_p5 = scmp.lt.s32.totalorder %s105_s21, %s105_s21 }
   0xb   :  { %p112_p6 = por %p111_p5, %p110_p4 }
   0xd   :  { %p113_p7 = pnand %p112_p6, %p106_p3 }
   0xf   :  { %116 = shalt.err (!%p113_p7)
}
  0x10   :  { %19 = dma.hbm_to_vmem [thread:$0]  %s199_s0, 128, %s17_s13, [#allocation3]  }
  0x11   :  { %139 = dma.done.wait [#allocation3], 128  }
  0x12   :  { %140 = vsyncadd [#allocation3], 4294967168  ;;  %vm28_vm0 = vcmask 261120   ;;  %v27_v0 = vld [vmem:[#allocation2] sm:$0xff]  ;;  %v52_v20 = vlaneseq  ;;  %s144_s27 = smov [#allocation5]  }
  0x13   :  { %v29_v1 = vsel %vm28_vm0, %v27_v0, 0.0  ;;  %v50_v22 = vld [vmem:[%s200_s1] sm:$0x1]  ;;  %s79_s28 = sshll.u32 %s144_s27, 4  ;;  %s80_s28 = int_to_ptr.vmem [resolvable:$true] %s79_s28 }
  0x14   :  { %v30_v2 = vrot.slane %v29_v1, 4  ;;  %v53_v21 = vshrl.u32 %v52_v20, 7  ;;  %v88_v27 = vld [vmem:[%s201_s2] ss:$0 sm:$0xff]  ;;  %s117_s1 = scalar_lea.vmem %s80_s28, 128  ;;  %p122_p9 = scmp.lt.s32.totalorder %s80_s28, %s80_s28 }
  0x15   :  { %p118_p8 = scmp.ne.s32.totalorder %s80_s28, %s117_s1  ;;  %p123_p10 = scmp.lt.s32.totalorder %s117_s1, %s117_s1 }
  0x16   :  { %v31_v3 = vadd.f32 %v30_v2, %v29_v1  ;;  %v54_v23 = vsub.s32 0, %v53_v21 }
  0x17   :  { %p124_p11 = por %p123_p10, %p122_p9 }
  0x18   :  { %v32_v4 = vrot.slane %v31_v3, 2 }
  0x19   :  { %p125_p12 = pnand %p124_p11, %p118_p8 }
  0x1a   :  { %v33_v5 = vadd.f32 %v32_v4, %v31_v3 }
  0x1c   :  { %v34_v6 = vrot.slane %v33_v5, 1 }
  0x1e   :  { %v35_v7 = vadd.f32 %v34_v6, %v33_v5 }
  0x20   :  { %v37_v8 = vmul.f32 0.125, %v35_v7 }
  0x22   :  { %v38_v9 = vsub.f32 %v27_v0, %v37_v8 }
  0x24   :  { %v39_v10 = vmul.f32 %v38_v9, %v38_v9 }
  0x26   :  { %v40_v11 = vsel %vm28_vm0, %v39_v10, 0.0 }
  0x27   :  { %v41_v12 = vrot.slane %v40_v11, 4 }
  0x29   :  { %v42_v13 = vadd.f32 %v41_v12, %v40_v11 }
  0x2b   :  { %v43_v14 = vrot.slane %v42_v13, 2 }
  0x2d   :  { %v44_v15 = vadd.f32 %v43_v14, %v42_v13 }
  0x2f   :  { %v45_v16 = vrot.slane %v44_v15, 1 }
  0x31   :  { %v46_v17 = vadd.f32 %v45_v16, %v44_v15 }
  0x33   :  { %v47_v18 = vmul.f32 0.125, %v46_v17 }
  0x35   :  { %v48_v19 = vadd.f32 1e-05, %v47_v18 }
  0x37   :  { %91 = vrsqrt.f32 %v48_v19 }
  0x41   :  { %v92_v24 = vpop.eup %91 }
  0x42   :  { %v51_v25 = vmul.f32 %v92_v24, %v50_v22 }
  0x44   :  { %v55_v26 = vrot.slane %v51_v25, %v54_v23 }
  0x46   :  { %v56_v28 = vmul.f32 %v55_v26, %v38_v9 }
  0x48   :  { %v64_v29 = vadd.f32 %v88_v27, %v56_v28 }
  0x4a   :  { %v65_v30 = vmul.f32 %v64_v29, %v64_v29 }
  0x4c   :  { %v66_v31 = vsel %vm28_vm0, %v65_v30, 0.0 }
  0x4d   :  { %67 = vadd.xlane.f32.xlu0 %v66_v31 }
  0xda   :  { %v68_v32 = vpop.xlane.xlu0 %67 }
  0xdb   :  { %v69_v33 = vmax.f32 %v68_v32, 1e-16 }
  0xdd   :  { %93 = vrsqrt.f32 %v69_v33 }
  0xe7   :  { %v94_v34 = vpop.eup %93 }
  0xe8   :  { %v71_v35 = vmul.f32 %v94_v34, %v64_v29 }
  0xea   :  { %72 = vst.msk [vmem:[#allocation5] sm:$0xff] %vm28_vm0, %v71_v35 }
  0xeb   :  { %128 = shalt.err (!%p125_p12)
}
  0xec   :  { %s129_s30 = scalar_lea.hbm %s202_s3, 128 }
  0xed   :  { %p130_p13 = scmp.ne.s32.totalorder %s202_s3, %s129_s30  ;;  %p133_p0 = scmp.lt.u32.totalorder %s129_s30, %s202_s3 }
  0xef   :  { %p135_p1 = pnand %p133_p0, %p130_p13 }
  0xf1   :  { %138 = shalt.err (!%p135_p1)
}
  0xf2   :  { %82 = dma.vmem_to_hbm [thread:$0]  %s80_s28, 128, %s202_s3, [#allocation4]  }
  0xf3   :  { %141 = dma.done.wait [#allocation4], 128  }
  0xf4   :  { %142 = vsyncadd [#allocation4], 4294967168 }
  0xf5   :  { %86 = vsyncpa [#allocation3], 1 }
  0xf6   :  { %87 = vsyncpa [#allocation4], 1 }

</bundles_post_ra>
